<compile_context>
chip_gen: v6e
topology: v6e:2x2x1
jax: 0.10.0
libtpu: 0.0.40
codegen_flags: <defaults>
</compile_context>

<pallas_src>
import functools

import jax
import jax.numpy as jnp
from jax import lax
from jax.experimental import pallas as pl
from jax.experimental.pallas import tpu as pltpu


TILE_SRC = 128  # src tile = vreg lane width; the gate's lane axis.


def _round_up(v, m):
    return (v + m - 1) // m * m


# -----------------------------------------------------------------------------
# Kernel 1: projection.
#   h   = x @ W
#   h1h = h @ (a1/2)      (dst half of the gate pre-activation, already /2)
#   h2h = h @ (a2/2)      (src half of the gate pre-activation, already /2)
#   hsh = h / 2           (src message, pre-scaled by the sigmoid's 0.5)
# Two separate gate matmuls (no fused weight + in-kernel lane slicing).
# -----------------------------------------------------------------------------
def _proj_kernel(x_ref, w_ref, a1h_ref, a2h_ref, h1h_ref, h2h_ref, hsh_ref):
    h = jnp.dot(x_ref[...], w_ref[...], preferred_element_type=jnp.float32)
    h1h_ref[...] = jnp.dot(h, a1h_ref[...], preferred_element_type=jnp.float32)
    h2h_ref[...] = jnp.dot(h, a2h_ref[...], preferred_element_type=jnp.float32)
    hsh_ref[...] = 0.5 * h


# -----------------------------------------------------------------------------
# Kernel 2: gated aggregation + ELU.
#   grid = (dst tiles [parallel], src tiles [arbitrary / reduction, innermost])
#
#   Per step the gate is computed as a (row_chunk, D, TILE_SRC) slab whose
#   minor axis is the 128-wide src tile (lane-dense).  The contribution
#     adj[i,j] * (tanh(h1h[i,d] + h2h[j,d]) + 1) * (h[j,d]/2)
#   is accumulated into a VMEM f32 accumulator that keeps the src-lane axis
#   unreduced; the lane fold + ELU happen once per dst tile at finalize.
# -----------------------------------------------------------------------------
def _agg_kernel(h1h_ref, adj_ref, h2ht_ref, hsht_ref, out_ref, acc_ref, *,
                tile_src, row_chunk, concat, gate_dtype):
    j = pl.program_id(1)
    n_j = pl.num_programs(1)
    tile_dst = out_ref.shape[0]

    @pl.when(j == 0)
    def _init():
        acc_ref[...] = jnp.zeros_like(acc_ref)

    # Current src window of the VMEM-resident transposed projections (D, N).
    col0 = pl.multiple_of(j * tile_src, tile_src)
    h2t = h2ht_ref[:, pl.ds(col0, tile_src)].astype(gate_dtype)   # (D, TJ)
    hst = hsht_ref[:, pl.ds(col0, tile_src)].astype(gate_dtype)   # (D, TJ)

    def chunk_body(c, carry):
        r0 = pl.multiple_of(c * row_chunk, row_chunk)
        rows = pl.ds(r0, row_chunk)
        h1 = h1h_ref[rows, :].astype(gate_dtype)          # (RC, D)
        adj = adj_ref[rows, :].astype(gate_dtype)         # (RC, TJ)
        # sigmoid(h1_full + h2_full) == 0.5*tanh(h1h + h2h) + 0.5; the 0.5 is
        # pre-folded into hst (= h[src]/2), so only "+1" remains here.
        # Broadcasts of h2t/hst are kept inline (hoisting the materialized
        # (RC, D, TJ) slabs would pin 2*32 vregs and force spills instead).
        g = jnp.tanh(h1[:, :, None] + h2t[None, :, :]) + 1.0      # (RC, D, TJ)
        contrib = adj[:, None, :] * (g * hst[None, :, :])         # (RC, D, TJ)
        acc_ref[rows, :, :] += contrib.astype(jnp.float32)        # f32 accum
        return carry

    lax.fori_loop(0, tile_dst // row_chunk, chunk_body, 0, unroll=True)

    @pl.when(j == n_j - 1)
    def _finalize():
        # Fold the src-lane axis once per dst tile (amortized over all src
        # tiles), then apply ELU (alpha = 1.0, matching F.elu defaults).
        hp = jnp.sum(acc_ref[...], axis=-1)                       # (TM, D)
        if concat:
            out_ref[...] = jnp.where(hp > 0.0, hp, jnp.expm1(hp))
        else:
            out_ref[...] = hp


def sparse_graph_gated_attention(x, adj, W, a1, a2, *, concat=True,
                                 tile_dst=128, row_chunk=8,
                                 gate_dtype=jnp.float32):
    n, d_in = x.shape
    d_out = W.shape[1]

    x = x.astype(jnp.float32)
    adj = adj.astype(jnp.float32)
    W = W.astype(jnp.float32)
    # Fold the 1/2 of sigmoid(z) = 0.5*tanh(z/2) + 0.5 into the gate weights.
    a1h = 0.5 * a1.astype(jnp.float32)
    a2h = 0.5 * a2.astype(jnp.float32)

    # Pad the node count to the 128-wide src tile.  Padded rows/cols of adj
    # are zero so they contribute nothing; padded destinations give elu(0)=0
    # and are sliced off at the end.  (For a static graph, pad + cache adj_p
    # outside the jitted forward to avoid re-copying the N^2 adjacency.)
    n_pad = _round_up(n, TILE_SRC)
    x_p = jnp.pad(x, ((0, n_pad - n), (0, 0)))
    adj_p = jnp.pad(adj, ((0, n_pad - n), (0, n_pad - n)))

    # Keep >= 2 dst tiles so the "parallel" dst axis can feed both v7x cores.
    if n_pad // tile_dst < 2:
        tile_dst = max(row_chunk, n_pad // 2)
    assert tile_dst % row_chunk == 0 and n_pad % tile_dst == 0

    n_i = n_pad // tile_dst
    n_j = n_pad // TILE_SRC

    # ------------------------- projection -------------------------
    proj_tile = max(t for t in (512, 256, 128) if n_pad % t == 0)
    h1h, h2h, hsh = pl.pallas_call(
        _proj_kernel,
        out_shape=(jax.ShapeDtypeStruct((n_pad, d_out), jnp.float32),
                   jax.ShapeDtypeStruct((n_pad, d_out), jnp.float32),
                   jax.ShapeDtypeStruct((n_pad, d_out), jnp.float32)),
        grid_spec=pltpu.PrefetchScalarGridSpec(
            num_scalar_prefetch=0,
            grid=(n_pad // proj_tile,),
            in_specs=[
                pl.BlockSpec((proj_tile, d_in), lambda i: (i, 0)),
                pl.BlockSpec((d_in, d_out), lambda i: (0, 0)),    # W pinned
                pl.BlockSpec((d_out, d_out), lambda i: (0, 0)),   # a1/2 pinned
                pl.BlockSpec((d_out, d_out), lambda i: (0, 0)),   # a2/2 pinned
            ],
            out_specs=(
                pl.BlockSpec((proj_tile, d_out), lambda i: (i, 0)),
                pl.BlockSpec((proj_tile, d_out), lambda i: (i, 0)),
                pl.BlockSpec((proj_tile, d_out), lambda i: (i, 0)),
            ),
        ),
        compiler_params=pltpu.CompilerParams(
            dimension_semantics=("parallel",)),
    )(x_p, W, a1h, a2h)

    # Src-side tensors transposed once (cheap XLA transposes of (N, 32)
    # arrays) so the aggregation kernel's gate has the src tile on lanes.
    h2ht = h2h.T           # (d_out, n_pad)
    hsht = hsh.T           # (d_out, n_pad)

    # ---------------------- gated aggregation ----------------------
    out_p = pl.pallas_call(
        functools.partial(_agg_kernel, tile_src=TILE_SRC, row_chunk=row_chunk,
                          concat=concat, gate_dtype=gate_dtype),
        out_shape=jax.ShapeDtypeStruct((n_pad, d_out), jnp.float32),
        grid_spec=pltpu.PrefetchScalarGridSpec(
            num_scalar_prefetch=0,
            grid=(n_i, n_j),
            in_specs=[
                pl.BlockSpec((tile_dst, d_out), lambda i, j: (i, 0)),     # h1h
                pl.BlockSpec((tile_dst, TILE_SRC), lambda i, j: (i, j)),  # adj
                pl.BlockSpec((d_out, n_pad), lambda i, j: (0, 0)),  # h2^T resident
                pl.BlockSpec((d_out, n_pad), lambda i, j: (0, 0)),  # (h/2)^T resident
            ],
            out_specs=pl.BlockSpec((tile_dst, d_out), lambda i, j: (i, 0)),
            scratch_shapes=[
                pltpu.VMEM((tile_dst, d_out, TILE_SRC), jnp.float32)],
        ),
        compiler_params=pltpu.CompilerParams(
            dimension_semantics=("parallel", "arbitrary"),
            vmem_limit_bytes=32 * 1024 * 1024,
        ),
    )(h1h, adj_p, h2ht, hsht)

    return out_p[:n]


# TODO(synk): with a single 32-wide head the final (tile_dst, 32) store and the
# small projection outputs are masked partial stores; packing multiple heads
# along the feature axis (D_total >= 128) would make them lane-dense but
# changes the layer's interface, so it is not done here.


def _xavier_uniform(key, shape, gain):
    fan_in, fan_out = shape
    bound = gain * jnp.sqrt(6.0 / (fan_in + fan_out))
    return jax.random.uniform(key, shape, jnp.float32, -bound, bound)


def _reference(x, adj, W, a1, a2, concat=True):
    h = x @ W
    h1 = h @ a1
    h2 = h @ a2
    gate = jax.nn.sigmoid(h1[:, None, :] + h2[None, :, :])      # (N, N, D)
    msg = gate * h[None, :, :]                                  # (N, N, D)
    h_prime = jnp.sum(adj[:, :, None] * msg, axis=1)            # (N, D)
    if concat:
        return jnp.where(h_prime > 0, h_prime, jnp.expm1(h_prime))
    return h_prime


if __name__ == "__main__":
    key = jax.random.PRNGKey(0)
    k_x, k_adj_m, k_adj_v, k_w, k_a1, k_a2 = jax.random.split(key, 6)

    N = 16            # number of graph nodes
    IN_FEATURES = 32
    OUT_FEATURES = 32
    GAIN = jnp.sqrt(2.0)

    # Node features.
    x = jax.random.normal(k_x, (N, IN_FEATURES), dtype=jnp.float32)

    # Sparse-pattern adjacency stored densely (zeros = missing edges).
    mask = (jax.random.uniform(k_adj_m, (N, N)) < 0.25).astype(jnp.float32)
    vals = jax.random.uniform(k_adj_v, (N, N), minval=0.1, maxval=1.0)
    adj = (mask * vals).astype(jnp.float32)

    # Parameters (deterministic xavier_uniform with gain sqrt(2), as in __init__).
    W = _xavier_uniform(k_w, (IN_FEATURES, OUT_FEATURES), GAIN)
    a1 = _xavier_uniform(k_a1, (OUT_FEATURES, OUT_FEATURES), GAIN)
    a2 = _xavier_uniform(k_a2, (OUT_FEATURES, OUT_FEATURES), GAIN)

    out = sparse_graph_gated_attention(x, adj, W, a1, a2, concat=True)
    out = jax.block_until_ready(out)

    ref = _reference(x, adj, W, a1, a2, concat=True)
    assert out.shape == (N, OUT_FEATURES)
    assert jnp.allclose(out, ref, rtol=2e-3, atol=2e-3), "mismatch vs reference"

    print("KERNEL_OK")
</pallas_src>

<mosaic_0001>
module attributes {stable_mosaic.version = 11 : i64} {
  func.func @_proj_kernel(%arg0: i32, %arg1: memref<128x32xf32, #tpu.memory_space<vmem>>, %arg2: memref<32x32xf32, #tpu.memory_space<vmem>>, %arg3: memref<32x32xf32, #tpu.memory_space<vmem>>, %arg4: memref<32x32xf32, #tpu.memory_space<vmem>>, %arg5: memref<128x32xf32, #tpu.memory_space<vmem>>, %arg6: memref<128x32xf32, #tpu.memory_space<vmem>>, %arg7: memref<128x32xf32, #tpu.memory_space<vmem>>) attributes {dimension_semantics = [#tpu.dimension_semantics<parallel>], iteration_bounds = array<i64: 1>, scalar_prefetch = 0 : i64, scratch_operands = 0 : i64, tpu.core_type = #tpu.core_type<tc>, window_params = [{transform_indices = @transform_0, window_bounds = array<i64: 128, 32>}, {pipeline_mode = #tpu.pipeline_mode<synchronous>, transform_indices = @transform_1, window_bounds = array<i64: 32, 32>}, {pipeline_mode = #tpu.pipeline_mode<synchronous>, transform_indices = @transform_2, window_bounds = array<i64: 32, 32>}, {pipeline_mode = #tpu.pipeline_mode<synchronous>, transform_indices = @transform_3, window_bounds = array<i64: 32, 32>}, {transform_indices = @transform_4, window_bounds = array<i64: 128, 32>}, {transform_indices = @transform_5, window_bounds = array<i64: 128, 32>}, {transform_indices = @transform_6, window_bounds = array<i64: 128, 32>}]} {
    %c0 = arith.constant 0 : index
    %c0_0 = arith.constant 0 : index
    %0 = vector.load %arg1[%c0, %c0_0] : memref<128x32xf32, #tpu.memory_space<vmem>>, vector<128x32xf32>
    %c0_1 = arith.constant 0 : index
    %c0_2 = arith.constant 0 : index
    %1 = vector.load %arg2[%c0_1, %c0_2] : memref<32x32xf32, #tpu.memory_space<vmem>>, vector<32x32xf32>
    %cst = arith.constant dense<0.000000e+00> : vector<128x32xf32>
    %2 = tpu.matmul %0, %1, %cst {dimension_numbers = #tpu.dot_dimension_numbers<[1], [0], [0], [1], [0, 0, 1, 1], [], []>} : vector<128x32xf32>, vector<32x32xf32>, vector<128x32xf32> -> vector<128x32xf32>
    %c0_3 = arith.constant 0 : index
    %c0_4 = arith.constant 0 : index
    %3 = vector.load %arg3[%c0_3, %c0_4] : memref<32x32xf32, #tpu.memory_space<vmem>>, vector<32x32xf32>
    %cst_5 = arith.constant dense<0.000000e+00> : vector<128x32xf32>
    %4 = tpu.matmul %2, %3, %cst_5 {dimension_numbers = #tpu.dot_dimension_numbers<[1], [0], [0], [1], [0, 0, 1, 1], [], []>} : vector<128x32xf32>, vector<32x32xf32>, vector<128x32xf32> -> vector<128x32xf32>
    %c0_6 = arith.constant 0 : index
    %c0_7 = arith.constant 0 : index
    %5 = vector.load %arg5[%c0_6, %c0_7] : memref<128x32xf32, #tpu.memory_space<vmem>>, vector<128x32xf32>
    tpu.vector_store %arg5[%c0_6, %c0_7], %4 {strides = array<i32>} : memref<128x32xf32, #tpu.memory_space<vmem>>, vector<128x32xf32>,
    %c0_8 = arith.constant 0 : index
    %c0_9 = arith.constant 0 : index
    %6 = vector.load %arg4[%c0_8, %c0_9] : memref<32x32xf32, #tpu.memory_space<vmem>>, vector<32x32xf32>
    %cst_10 = arith.constant dense<0.000000e+00> : vector<128x32xf32>
    %7 = tpu.matmul %2, %6, %cst_10 {dimension_numbers = #tpu.dot_dimension_numbers<[1], [0], [0], [1], [0, 0, 1, 1], [], []>} : vector<128x32xf32>, vector<32x32xf32>, vector<128x32xf32> -> vector<128x32xf32>
    %c0_11 = arith.constant 0 : index
    %c0_12 = arith.constant 0 : index
    %8 = vector.load %arg6[%c0_11, %c0_12] : memref<128x32xf32, #tpu.memory_space<vmem>>, vector<128x32xf32>
    tpu.vector_store %arg6[%c0_11, %c0_12], %7 {strides = array<i32>} : memref<128x32xf32, #tpu.memory_space<vmem>>, vector<128x32xf32>,
    %cst_13 = arith.constant 5.000000e-01 : f32
    %9 = vector.broadcast %cst_13 : f32 to vector<128x32xf32>
    %10 = arith.mulf %9, %2 : vector<128x32xf32>
    %c0_14 = arith.constant 0 : index
    %c0_15 = arith.constant 0 : index
    %11 = vector.load %arg7[%c0_14, %c0_15] : memref<128x32xf32, #tpu.memory_space<vmem>>, vector<128x32xf32>
    tpu.vector_store %arg7[%c0_14, %c0_15], %10 {strides = array<i32>} : memref<128x32xf32, #tpu.memory_space<vmem>>, vector<128x32xf32>,
    return
  }
  func.func @transform_0(%arg0: i32) -> (i32, i32) {
    %c0_i32 = arith.constant 0 : i32
    %c0_i32_0 = arith.constant 0 : i32
    return %arg0, %c0_i32 : i32, i32
  }
  func.func @transform_1(%arg0: i32) -> (i32, i32) {
    %c0_i32 = arith.constant 0 : i32
    %c0_i32_0 = arith.constant 0 : i32
    %c0_i32_1 = arith.constant 0 : i32
    return %c0_i32, %c0_i32_0 : i32, i32
  }
  func.func @transform_2(%arg0: i32) -> (i32, i32) {
    %c0_i32 = arith.constant 0 : i32
    %c0_i32_0 = arith.constant 0 : i32
    %c0_i32_1 = arith.constant 0 : i32
    return %c0_i32, %c0_i32_0 : i32, i32
  }
  func.func @transform_3(%arg0: i32) -> (i32, i32) {
    %c0_i32 = arith.constant 0 : i32
    %c0_i32_0 = arith.constant 0 : i32
    %c0_i32_1 = arith.constant 0 : i32
    return %c0_i32, %c0_i32_0 : i32, i32
  }
  func.func @transform_4(%arg0: i32) -> (i32, i32) {
    %c0_i32 = arith.constant 0 : i32
    %c0_i32_0 = arith.constant 0 : i32
    return %arg0, %c0_i32 : i32, i32
  }
  func.func @transform_5(%arg0: i32) -> (i32, i32) {
    %c0_i32 = arith.constant 0 : i32
    %c0_i32_0 = arith.constant 0 : i32
    return %arg0, %c0_i32 : i32, i32
  }
  func.func @transform_6(%arg0: i32) -> (i32, i32) {
    %c0_i32 = arith.constant 0 : i32
    %c0_i32_0 = arith.constant 0 : i32
    return %arg0, %c0_i32 : i32, i32
  }
}

</mosaic_0001>

<bundles_post_ra>
// kernel: tpu_custom_call.1
= control target key start
LH: loop header
LB: loop body
LE: loop exit
PB: predicated region body
PF: predicated region fallthrough
CT: control target
= control target key end

     0   :  { %vm40_vm0 = vcmask 261120   ;;  %s1232_s1 = inlined_call_operand.vmem [shape: f32[32,32], index: 1, kind: input, shape index: {}]   ;;  %s1233_s0 = inlined_call_operand.vmem [shape: f32[128,32], index: 0, kind: input, shape index: {}]   ;;  %s1234_s2 = inlined_call_operand.vmem [shape: f32[32,32], index: 2, kind: input, shape index: {}]   ;;  %s1235_s3 = inlined_call_operand.vmem [shape: f32[32,32], index: 3, kind: input, shape index: {}]   ;;  %s1236_s6 = inlined_call_operand.vmem [shape: f32[128,32], index: 6, kind: output, shape index: {2}]   ;;  %s1237_s4 = inlined_call_operand.vmem [shape: f32[128,32], index: 4, kind: output, shape index: {0}]   ;;  %s1238_s5 = inlined_call_operand.vmem [shape: f32[128,32], index: 5, kind: output, shape index: {1}]  }
   0x1   :  { %v39_v0 = vld [vmem:[%s1232_s1 + $0x18] sm:$0xff]  ;;  %v38_v1 = vld [vmem:[%s1232_s1 + $0x10] sm:$0xff]  ;;  %v20_v2 = vld [vmem:[%s1233_s0] sm:$0xff] }
   0x2   :  { %764 = vmatprep.subr.mxu0 %v39_v0  ;;  %860 = vmatprep.subr.mxu1 %v39_v0  ;;  %v37_v3 = vld [vmem:[%s1232_s1 + $0x8] sm:$0xff]  ;;  %v36_v4 = vld [vmem:[%s1232_s1] sm:$0xff]  ;;  %v22_v6 = vld [vmem:[%s1233_s0 + $0x10] sm:$0xff] }
   0x3   :  { %765 = vmatpush3.msra.mxu0 %v39_v0  ;;  %772 = vmatprep.mubr.msk.f32.mxu0 %vm40_vm0, %v20_v2  ;;  %v21_v5 = vld [vmem:[%s1233_s0 + $0x8] sm:$0xff]  ;;  %v28_v7 = vld [vmem:[%s1233_s0 + $0x40] sm:$0xff]  ;;  %v237_v9 = vld [vmem:[%s1234_s2 + $0x18] sm:$0xff] }
   0x4   :  { %766 = vmatprep.subr.mxu0 %v38_v1  ;;  %864 = vmatpush3.msra.mxu1 %v39_v0  ;;  %v29_v8 = vld [vmem:[%s1233_s0 + $0x48] sm:$0xff]  ;;  %v30_v10 = vld [vmem:[%s1233_s0 + $0x50] sm:$0xff]  ;;  %v450_v11 = vld [vmem:[%s1235_s3 + $0x18] sm:$0xff] }
   0x5   :  { %767 = vmatpush3.msra.mxu0 %v38_v1  ;;  %861 = vmatprep.subr.mxu1 %v38_v1  ;;  %v23_v12 = vld [vmem:[%s1233_s0 + $0x18] sm:$0xff]  ;;  %v24_v13 = vld [vmem:[%s1233_s0 + $0x20] sm:$0xff]  ;;  %v236_v15 = vld [vmem:[%s1234_s2 + $0x10] sm:$0xff] }
   0x6   :  { %768 = vmatprep.subr.mxu0 %v37_v3  ;;  %865 = vmatpush3.msra.mxu1 %v38_v1  ;;  %v31_v14 = vld [vmem:[%s1233_s0 + $0x58] sm:$0xff]  ;;  %v32_v16 = vld [vmem:[%s1233_s0 + $0x60] sm:$0xff]  ;;  %v449_v17 = vld [vmem:[%s1235_s3 + $0x10] sm:$0xff] }
   0x7   :  { %769 = vmatpush3.msra.mxu0 %v37_v3  ;;  %862 = vmatprep.subr.mxu1 %v37_v3  ;;  %v25_v18 = vld [vmem:[%s1233_s0 + $0x28] sm:$0xff]  ;;  %v26_v19 = vld [vmem:[%s1233_s0 + $0x30] sm:$0xff]  ;;  %v27_v24 = vld [vmem:[%s1233_s0 + $0x38] sm:$0xff] }
   0x8   :  { %770 = vmatprep.subr.mxu0 %v36_v4  ;;  %866 = vmatpush3.msra.mxu1 %v37_v3  ;;  %v33_v20 = vld [vmem:[%s1233_s0 + $0x68] sm:$0xff]  ;;  %v34_v22 = vld [vmem:[%s1233_s0 + $0x70] sm:$0xff]  ;;  %v234_v25 = vld [vmem:[%s1234_s2] sm:$0xff] }
   0x9   :  { %771 = vmatpush3.msra.mxu0 %v36_v4  ;;  %863 = vmatprep.subr.mxu1 %v36_v4  ;;  %v235_v21 = vld [vmem:[%s1234_s2 + $0x8] sm:$0xff]  ;;  %v35_v26 = vld [vmem:[%s1233_s0 + $0x78] sm:$0xff]  ;;  %v447_v27 = vld [vmem:[%s1235_s3] sm:$0xff] }
   0xa   :  { %773 = vmatmul.mubr.msk.f32.vlgmr.msra.gmra.mxu0 %vm40_vm0, %v21_v5  ;;  %867 = vmatpush3.msra.mxu1 %v36_v4  ;;  %v448_v23 = vld [vmem:[%s1235_s3 + $0x8] sm:$0xff] }
   0xb   :  { %775 = vmatprep.mubr.msk.f32.mxu0 %vm40_vm0, %v22_v6  ;;  %784 = vmatprep.mubr.msk.f32.mxu1 %vm40_vm0, %v28_v7 }
   0xc   :  { %785 = vmatmul.mubr.msk.f32.vlgmr.msra.gmra.mxu1 %vm40_vm0, %v29_v8  ;;  %796 = vmatprep.subr.mxu1 %v237_v9 }
   0xd   :  { %787 = vmatprep.mubr.msk.f32.mxu1 %vm40_vm0, %v30_v10  ;;  %828 = vmatprep.subr.mxu0 %v450_v11 }
   0xe   :  { %776 = vmatmul.mubr.msk.f32.gmra.mxu0 %vm40_vm0, %v23_v12  ;;  %797 = vmatpush3.msra.mxu1 %v237_v9 }
   0xf   :  { %778 = vmatprep.mubr.msk.f32.mxu0 %vm40_vm0, %v24_v13  ;;  %829 = vmatpush3.msra.mxu0 %v450_v11 }
  0x10   :  { %788 = vmatmul.mubr.msk.f32.gmra.mxu1 %vm40_vm0, %v31_v14  ;;  %798 = vmatprep.subr.mxu1 %v236_v15 }
  0x11   :  { %790 = vmatprep.mubr.msk.f32.mxu1 %vm40_vm0, %v32_v16  ;;  %830 = vmatprep.subr.mxu0 %v449_v17 }
  0x12   :  { %779 = vmatmul.mubr.msk.f32.gmra.mxu0 %vm40_vm0, %v25_v18  ;;  %799 = vmatpush3.msra.mxu1 %v236_v15 }
  0x13   :  { %781 = vmatprep.mubr.msk.f32.mxu0 %vm40_vm0, %v26_v19  ;;  %831 = vmatpush3.msra.mxu0 %v449_v17 }
  0x14   :  { %791 = vmatmul.mubr.msk.f32.gmra.mxu1 %vm40_vm0, %v33_v20  ;;  %800 = vmatprep.subr.mxu1 %v235_v21 }
  0x15   :  { %793 = vmatprep.mubr.msk.f32.mxu1 %vm40_vm0, %v34_v22  ;;  %832 = vmatprep.subr.mxu0 %v448_v23 }
  0x16   :  { %782 = vmatmul.mubr.msk.f32.gmra.mxu0 %vm40_vm0, %v27_v24  ;;  %801 = vmatpush3.msra.mxu1 %v235_v21 }
  0x17   :  { %833 = vmatpush3.msra.mxu0 %v448_v23  ;;  %802 = vmatprep.subr.mxu1 %v234_v25 }
  0x18   :  { %794 = vmatmul.mubr.msk.f32.gmra.mxu1 %vm40_vm0, %v35_v26  ;;  %834 = vmatprep.subr.mxu0 %v447_v27 }
  0x19   :  { %803 = vmatpush3.msra.mxu1 %v234_v25  ;;  %835 = vmatpush3.msra.mxu0 %v447_v27 }
  0xca   :  { %v774_v28 = vpop.f32.mrf.mxu0 }
  0xcb   :  { %v613_v29 = vmul.f32 0.5, %v774_v28 }
  0xcc   :  { %v155_v30 = vpop.f32.mrf.mxu0  ;;  %v1003_v31 = vpop.f32.mrf.mxu1 }
  0xcd   :  { %629 = vst.msk [vmem:[%s1236_s6 + $0x8] sm:$0xff] %vm40_vm0, %v613_v29  ;;  %v612_v32 = vmul.f32 0.5, %v155_v30  ;;  %804 = vmatprep.mubr.msk.f32.mxu1 %vm40_vm0, %v155_v30  ;;  %836 = vmatprep.mubr.msk.f32.mxu0 %vm40_vm0, %v155_v30  ;;  %v621_v33 = vmul.f32 0.5, %v1003_v31 }
  0xce   :  { %v777_v34 = vpop.f32.mrf.mxu0  ;;  %805 = vmatmul.mubr.msk.f32.vlgmr.msra.gmra.mxu1 %vm40_vm0, %v774_v28  ;;  %837 = vmatmul.mubr.msk.f32.vlgmr.msra.gmra.mxu0 %vm40_vm0, %v774_v28  ;;  %v195_v35 = vpop.f32.mrf.mxu1 }
  0xcf   :  { %628 = vst.msk [vmem:[%s1236_s6] sm:$0xff] %vm40_vm0, %v612_v32  ;;  %v615_v36 = vmul.f32 0.5, %v777_v34  ;;  %637 = vst.msk [vmem:[%s1236_s6 + $0x48] sm:$0xff] %vm40_vm0, %v621_v33  ;;  %v620_v37 = vmul.f32 0.5, %v195_v35 }
  0xd0   :  { %v165_v38 = vpop.f32.mrf.mxu0  ;;  %v789_v39 = vpop.f32.mrf.mxu1 }
  0xd1   :  { %631 = vst.msk [vmem:[%s1236_s6 + $0x18] sm:$0xff] %vm40_vm0, %v615_v36  ;;  %v614_v40 = vmul.f32 0.5, %v165_v38  ;;  %807 = vmatprep.mubr.msk.f32.mxu1 %vm40_vm0, %v165_v38  ;;  %839 = vmatprep.mubr.msk.f32.mxu0 %vm40_vm0, %v165_v38  ;;  %636 = vst.msk [vmem:[%s1236_s6 + $0x40] sm:$0xff] %vm40_vm0, %v620_v37  ;;  %v623_v41 = vmul.f32 0.5, %v789_v39 }
  0xd2   :  { %v780_v42 = vpop.f32.mrf.mxu0  ;;  %808 = vmatmul.mubr.msk.f32.gmra.mxu1 %vm40_vm0, %v777_v34  ;;  %840 = vmatmul.mubr.msk.f32.gmra.mxu0 %vm40_vm0, %v777_v34  ;;  %v205_v43 = vpop.f32.mrf.mxu1 }
  0xd3   :  { %630 = vst.msk [vmem:[%s1236_s6 + $0x10] sm:$0xff] %vm40_vm0, %v614_v40  ;;  %v617_v44 = vmul.f32 0.5, %v780_v42  ;;  %639 = vst.msk [vmem:[%s1236_s6 + $0x58] sm:$0xff] %vm40_vm0, %v623_v41  ;;  %v622_v45 = vmul.f32 0.5, %v205_v43 }
  0xd4   :  { %v175_v46 = vpop.f32.mrf.mxu0  ;;  %v792_v47 = vpop.f32.mrf.mxu1 }
  0xd5   :  { %633 = vst.msk [vmem:[%s1236_s6 + $0x28] sm:$0xff] %vm40_vm0, %v617_v44  ;;  %v616_v48 = vmul.f32 0.5, %v175_v46  ;;  %810 = vmatprep.mubr.msk.f32.mxu1 %vm40_vm0, %v175_v46  ;;  %842 = vmatprep.mubr.msk.f32.mxu0 %vm40_vm0, %v175_v46  ;;  %638 = vst.msk [vmem:[%s1236_s6 + $0x50] sm:$0xff] %vm40_vm0, %v622_v45  ;;  %v625_v49 = vmul.f32 0.5, %v792_v47 }
  0xd6   :  { %v783_v50 = vpop.f32.mrf.mxu0  ;;  %811 = vmatmul.mubr.msk.f32.gmra.mxu1 %vm40_vm0, %v780_v42  ;;  %843 = vmatmul.mubr.msk.f32.gmra.mxu0 %vm40_vm0, %v780_v42  ;;  %v215_v51 = vpop.f32.mrf.mxu1 }
  0xd7   :  { %632 = vst.msk [vmem:[%s1236_s6 + $0x20] sm:$0xff] %vm40_vm0, %v616_v48  ;;  %v619_v52 = vmul.f32 0.5, %v783_v50  ;;  %641 = vst.msk [vmem:[%s1236_s6 + $0x68] sm:$0xff] %vm40_vm0, %v625_v49  ;;  %v624_v53 = vmul.f32 0.5, %v215_v51 }
  0xd8   :  { %v185_v54 = vpop.f32.mrf.mxu0  ;;  %v795_v55 = vpop.f32.mrf.mxu1 }
  0xd9   :  { %635 = vst.msk [vmem:[%s1236_s6 + $0x38] sm:$0xff] %vm40_vm0, %v619_v52  ;;  %v618_v56 = vmul.f32 0.5, %v185_v54  ;;  %813 = vmatprep.mubr.msk.f32.mxu1 %vm40_vm0, %v185_v54  ;;  %845 = vmatprep.mubr.msk.f32.mxu0 %vm40_vm0, %v185_v54  ;;  %640 = vst.msk [vmem:[%s1236_s6 + $0x60] sm:$0xff] %vm40_vm0, %v624_v53  ;;  %v627_v57 = vmul.f32 0.5, %v795_v55 }
  0xda   :  { %814 = vmatmul.mubr.msk.f32.gmra.mxu1 %vm40_vm0, %v783_v50  ;;  %846 = vmatmul.mubr.msk.f32.gmra.mxu0 %vm40_vm0, %v783_v50  ;;  %v225_v58 = vpop.f32.mrf.mxu1 }
  0xdb   :  { %634 = vst.msk [vmem:[%s1236_s6 + $0x30] sm:$0xff] %vm40_vm0, %v618_v56  ;;  %816 = vmatprep.mubr.msk.f32.mxu1 %vm40_vm0, %v195_v35  ;;  %848 = vmatprep.mubr.msk.f32.mxu0 %vm40_vm0, %v195_v35  ;;  %643 = vst.msk [vmem:[%s1236_s6 + $0x78] sm:$0xff] %vm40_vm0, %v627_v57  ;;  %v626_v59 = vmul.f32 0.5, %v225_v58 }
  0xdd   :  { %642 = vst.msk [vmem:[%s1236_s6 + $0x70] sm:$0xff] %vm40_vm0, %v626_v59 }
  0xde   :  { %817 = vmatmul.mubr.msk.f32.gmra.mxu1 %vm40_vm0, %v1003_v31  ;;  %849 = vmatmul.mubr.msk.f32.gmra.mxu0 %vm40_vm0, %v1003_v31 }
  0xdf   :  { %819 = vmatprep.mubr.msk.f32.mxu1 %vm40_vm0, %v205_v43  ;;  %851 = vmatprep.mubr.msk.f32.mxu0 %vm40_vm0, %v205_v43 }
  0xe2   :  { %820 = vmatmul.mubr.msk.f32.gmra.mxu1 %vm40_vm0, %v789_v39  ;;  %852 = vmatmul.mubr.msk.f32.gmra.mxu0 %vm40_vm0, %v789_v39 }
  0xe3   :  { %822 = vmatprep.mubr.msk.f32.mxu1 %vm40_vm0, %v215_v51  ;;  %854 = vmatprep.mubr.msk.f32.mxu0 %vm40_vm0, %v215_v51 }
  0xe6   :  { %823 = vmatmul.mubr.msk.f32.gmra.mxu1 %vm40_vm0, %v792_v47  ;;  %855 = vmatmul.mubr.msk.f32.gmra.mxu0 %vm40_vm0, %v792_v47 }
  0xe7   :  { %825 = vmatprep.mubr.msk.f32.mxu1 %vm40_vm0, %v225_v58  ;;  %857 = vmatprep.mubr.msk.f32.mxu0 %vm40_vm0, %v225_v58 }
  0xea   :  { %826 = vmatmul.mubr.msk.f32.gmra.mxu1 %vm40_vm0, %v795_v55  ;;  %858 = vmatmul.mubr.msk.f32.gmra.mxu0 %vm40_vm0, %v795_v55 }
 0x18e   :  { %v806_v60 = vpop.f32.mrf.mxu1  ;;  %v838_v61 = vpop.f32.mrf.mxu0 }
 0x18f   :  { %432 = vst.msk [vmem:[%s1237_s4 + $0x8] sm:$0xff] %vm40_vm0, %v806_v60  ;;  %597 = vst.msk [vmem:[%s1238_s5 + $0x8] sm:$0xff] %vm40_vm0, %v838_v61 }
 0x190   :  { %v352_v62 = vpop.f32.mrf.mxu1  ;;  %v517_v63 = vpop.f32.mrf.mxu0 }
 0x191   :  { %431 = vst.msk [vmem:[%s1237_s4] sm:$0xff] %vm40_vm0, %v352_v62  ;;  %596 = vst.msk [vmem:[%s1238_s5] sm:$0xff] %vm40_vm0, %v517_v63 }
 0x192   :  { %v809_v0 = vpop.f32.mrf.mxu1  ;;  %v841_v1 = vpop.f32.mrf.mxu0 }
 0x193   :  { %434 = vst.msk [vmem:[%s1237_s4 + $0x18] sm:$0xff] %vm40_vm0, %v809_v0  ;;  %599 = vst.msk [vmem:[%s1238_s5 + $0x18] sm:$0xff] %vm40_vm0, %v841_v1 }
 0x194   :  { %v362_v2 = vpop.f32.mrf.mxu1  ;;  %v527_v3 = vpop.f32.mrf.mxu0 }
 0x195   :  { %433 = vst.msk [vmem:[%s1237_s4 + $0x10] sm:$0xff] %vm40_vm0, %v362_v2  ;;  %598 = vst.msk [vmem:[%s1238_s5 + $0x10] sm:$0xff] %vm40_vm0, %v527_v3 }
 0x196   :  { %v812_v4 = vpop.f32.mrf.mxu1  ;;  %v844_v5 = vpop.f32.mrf.mxu0 }
 0x197   :  { %436 = vst.msk [vmem:[%s1237_s4 + $0x28] sm:$0xff] %vm40_vm0, %v812_v4  ;;  %601 = vst.msk [vmem:[%s1238_s5 + $0x28] sm:$0xff] %vm40_vm0, %v844_v5 }
 0x198   :  { %v372_v6 = vpop.f32.mrf.mxu1  ;;  %v537_v7 = vpop.f32.mrf.mxu0 }
 0x199   :  { %435 = vst.msk [vmem:[%s1237_s4 + $0x20] sm:$0xff] %vm40_vm0, %v372_v6  ;;  %600 = vst.msk [vmem:[%s1238_s5 + $0x20] sm:$0xff] %vm40_vm0, %v537_v7 }
 0x19a   :  { %v815_v8 = vpop.f32.mrf.mxu1  ;;  %v847_v9 = vpop.f32.mrf.mxu0 }
 0x19b   :  { %438 = vst.msk [vmem:[%s1237_s4 + $0x38] sm:$0xff] %vm40_vm0, %v815_v8  ;;  %603 = vst.msk [vmem:[%s1238_s5 + $0x38] sm:$0xff] %vm40_vm0, %v847_v9 }
 0x19c   :  { %v382_v10 = vpop.f32.mrf.mxu1  ;;  %v547_v11 = vpop.f32.mrf.mxu0 }
 0x19d   :  { %437 = vst.msk [vmem:[%s1237_s4 + $0x30] sm:$0xff] %vm40_vm0, %v382_v10  ;;  %602 = vst.msk [vmem:[%s1238_s5 + $0x30] sm:$0xff] %vm40_vm0, %v547_v11 }
 0x19e   :  { %v818_v12 = vpop.f32.mrf.mxu1  ;;  %v850_v13 = vpop.f32.mrf.mxu0 }
 0x19f   :  { %440 = vst.msk [vmem:[%s1237_s4 + $0x48] sm:$0xff] %vm40_vm0, %v818_v12  ;;  %605 = vst.msk [vmem:[%s1238_s5 + $0x48] sm:$0xff] %vm40_vm0, %v850_v13 }
 0x1a0   :  { %v392_v14 = vpop.f32.mrf.mxu1  ;;  %v557_v15 = vpop.f32.mrf.mxu0 }
 0x1a1   :  { %439 = vst.msk [vmem:[%s1237_s4 + $0x40] sm:$0xff] %vm40_vm0, %v392_v14  ;;  %604 = vst.msk [vmem:[%s1238_s5 + $0x40] sm:$0xff] %vm40_vm0, %v557_v15 }
 0x1a2   :  { %v821_v16 = vpop.f32.mrf.mxu1  ;;  %v853_v17 = vpop.f32.mrf.mxu0 }
 0x1a3   :  { %442 = vst.msk [vmem:[%s1237_s4 + $0x58] sm:$0xff] %vm40_vm0, %v821_v16  ;;  %607 = vst.msk [vmem:[%s1238_s5 + $0x58] sm:$0xff] %vm40_vm0, %v853_v17 }
 0x1a4   :  { %v402_v18 = vpop.f32.mrf.mxu1  ;;  %v567_v19 = vpop.f32.mrf.mxu0 }
 0x1a5   :  { %441 = vst.msk [vmem:[%s1237_s4 + $0x50] sm:$0xff] %vm40_vm0, %v402_v18  ;;  %606 = vst.msk [vmem:[%s1238_s5 + $0x50] sm:$0xff] %vm40_vm0, %v567_v19 }
 0x1a6   :  { %v824_v20 = vpop.f32.mrf.mxu1  ;;  %v856_v21 = vpop.f32.mrf.mxu0 }
 0x1a7   :  { %444 = vst.msk [vmem:[%s1237_s4 + $0x68] sm:$0xff] %vm40_vm0, %v824_v20  ;;  %609 = vst.msk [vmem:[%s1238_s5 + $0x68] sm:$0xff] %vm40_vm0, %v856_v21 }
 0x1a8   :  { %v412_v22 = vpop.f32.mrf.mxu1  ;;  %v577_v23 = vpop.f32.mrf.mxu0 }
 0x1a9   :  { %443 = vst.msk [vmem:[%s1237_s4 + $0x60] sm:$0xff] %vm40_vm0, %v412_v22  ;;  %608 = vst.msk [vmem:[%s1238_s5 + $0x60] sm:$0xff] %vm40_vm0, %v577_v23 }
 0x1aa   :  { %v827_v24 = vpop.f32.mrf.mxu1  ;;  %v859_v25 = vpop.f32.mrf.mxu0 }
 0x1ab   :  { %446 = vst.msk [vmem:[%s1237_s4 + $0x78] sm:$0xff] %vm40_vm0, %v827_v24  ;;  %611 = vst.msk [vmem:[%s1238_s5 + $0x78] sm:$0xff] %vm40_vm0, %v859_v25 }
 0x1ac   :  { %v422_v26 = vpop.f32.mrf.mxu1  ;;  %v587_v27 = vpop.f32.mrf.mxu0 }
 0x1ad   :  { %445 = vst.msk [vmem:[%s1237_s4 + $0x70] sm:$0xff] %vm40_vm0, %v422_v26  ;;  %610 = vst.msk [vmem:[%s1238_s5 + $0x70] sm:$0xff] %vm40_vm0, %v587_v27 }

</bundles_post_ra>
